<compile_context>
chip_gen: v7x
topology: tpu7x:2x2x1
jax: 0.10.0
libtpu: 0.0.40
codegen_flags: <defaults>
</compile_context>

<pallas_src>
import jax
import jax.numpy as jnp
from jax import lax
from jax.experimental import pallas as pl
from jax.experimental.pallas import tpu as pltpu

_LANE = 128


def _round_up(x: int, m: int) -> int:
    return ((x + m - 1) // m) * m


def _make_kernel(has_context, dim, ctx_dim, ctx_off, val_off, dim_pad):
    """Kernel factory; static layout constants are closed over."""

    def kernel(scalars_ref, *refs):
        if has_context:
            q_ref, ctx_ref, mem_ref, bias_ref, out_ref = refs
        else:
            q_ref, mem_ref, bias_ref, out_ref = refs

        current_time = scalars_ref[0]
        time_weight = scalars_ref[1]

        # Content scores: Frobenius inner product == flat dot with the keys.
        # Contract the lane axes of both operands natively on the MXU.
        scores = lax.dot_general(
            q_ref[...], mem_ref[:, 0:dim],
            dimension_numbers=(((1,), (1,)), ((), ())),
            preferred_element_type=jnp.float32)                       # (rows, M_pad)

        if has_context:
            # 0.5 context weight is pre-folded into the packed contexts.
            scores = scores + lax.dot_general(
                ctx_ref[...], mem_ref[:, ctx_off:ctx_off + ctx_dim],
                dimension_numbers=(((1,), (1,)), ((), ())),
                preferred_element_type=jnp.float32)

        ts_row = bias_ref[0:1, :]                                     # (1, M_pad) timestamps
        mask_row = bias_ref[1:2, :]                                   # 0 used / -1e9 unused+pad
        decay = jnp.exp(-time_weight * (current_time - ts_row))       # EUP, (1, M_pad)
        scores = scores + 0.3 * decay + mask_row                      # broadcast over rows

        # Softmax over memory slots.
        m = jnp.max(scores, axis=-1, keepdims=True)
        e = jnp.exp(scores - m)
        attn = e / jnp.sum(e, axis=-1, keepdims=True)                 # (rows, M_pad)

        # Attention-weighted sum of (flattened, lane-padded) value matrices.
        out_ref[...] = lax.dot_general(
            attn, mem_ref[:, val_off:val_off + dim_pad],
            dimension_numbers=(((1,), (0,)), ((), ())),
            preferred_element_type=jnp.float32).astype(out_ref.dtype)

    return kernel


def prepare_memory_params(mem_keys, mem_values, mem_contexts, mem_timestamps, used_slots):
    """One-time packing of module state into a kernel-friendly lane-dense layout.

    Re-run whenever the memory changes (store_episode); cached across forward
    calls so the hot path has zero reshape / cast / concat preamble.

    packed (M_pad, 3*128):
        [:,        0 : dim          ]  flattened keys
        [:,  dim_pad : dim_pad+ctx  ]  0.5 * contexts (weight pre-folded)
        [:,  val_off : val_off+dim  ]  flattened values
    bias (2, M_pad): row0 = timestamps (0 for padded slots),
                     row1 = 0 for used slots, -1e9 for unused / padded slots.
    """
    M, d1, d2 = mem_keys.shape
    dim = d1 * d2
    ctx_dim = mem_contexts.shape[1]
    dim_pad = _round_up(dim, _LANE)
    ctx_pad = _round_up(ctx_dim, _LANE)
    m_pad = _round_up(M, _LANE)
    val_off = dim_pad + ctx_pad

    keys_flat = mem_keys.reshape(M, dim).astype(jnp.float32)
    vals_flat = mem_values.reshape(M, dim).astype(jnp.float32)

    packed = jnp.zeros((m_pad, val_off + dim_pad), jnp.float32)
    packed = packed.at[:M, 0:dim].set(keys_flat)
    packed = packed.at[:M, dim_pad:dim_pad + ctx_dim].set(
        0.5 * mem_contexts.astype(jnp.float32))
    packed = packed.at[:M, val_off:val_off + dim].set(vals_flat)

    bias = jnp.zeros((2, m_pad), jnp.float32)
    bias = bias.at[0, :M].set(mem_timestamps.reshape(M).astype(jnp.float32))
    bias = bias.at[1, :].set(-1.0e9)
    bias = bias.at[1, :M].set(jnp.where(used_slots, 0.0, -1.0e9))

    return {"packed": packed, "bias": bias, "any_used": jnp.any(used_slots)}


def episodic_memory_forward(prepared, query, context, current_time,
                            time_weight=0.1, rng_key=None, block_rows=128):
    """Pallas implementation of TrueMatrixEpisodicMemory.forward (jit-friendly).

    prepared:     dict from prepare_memory_params (arrays only -> jit-safe)
    query:        [B, dim] float
    context:      [B, context_dim] float or None (static branch)
    current_time: scalar (python float or traced)
    """
    B, dim = query.shape
    query = query.astype(jnp.float32)
    packed = prepared["packed"]
    bias = prepared["bias"]
    m_pad = packed.shape[0]
    dim_pad = _round_up(dim, _LANE)
    ctx_off = dim_pad
    val_off = packed.shape[1] - dim_pad

    has_context = context is not None
    ctx_dim = context.shape[1] if has_context else 0
    if has_context:
        context = context.astype(jnp.float32)

    # Row blocking: multiples of 8 (f32 sublane), <= block_rows per grid step.
    blk = min(block_rows, _round_up(B, 8))
    rows_pad = _round_up(B, blk)
    grid = (rows_pad // blk,)
    if rows_pad != B:  # trace-time check; zero cost for aligned serving batches
        query = jnp.pad(query, ((0, rows_pad - B), (0, 0)))
        if has_context:
            context = jnp.pad(context, ((0, rows_pad - B), (0, 0)))

    scalars = jnp.stack([jnp.asarray(current_time, jnp.float32),
                         jnp.asarray(time_weight, jnp.float32)])

    kernel = _make_kernel(has_context, dim, ctx_dim, ctx_off, val_off, dim_pad)

    in_specs = [pl.BlockSpec(memory_space=pltpu.MemorySpace.SMEM),        # scalars
                pl.BlockSpec((blk, dim), lambda i: (i, 0))]               # query rows
    operands = [scalars, query]
    if has_context:
        in_specs.append(pl.BlockSpec((blk, ctx_dim), lambda i: (i, 0)))   # context rows
        operands.append(context)
    in_specs += [pl.BlockSpec((m_pad, packed.shape[1]), lambda i: (0, 0)),  # resident memory
                 pl.BlockSpec((2, m_pad), lambda i: (0, 0))]                # resident bias
    operands += [packed, bias]

    def run_kernel():
        out = pl.pallas_call(
            kernel,
            out_shape=jax.ShapeDtypeStruct((rows_pad, dim_pad), jnp.float32),
            grid=grid,
            in_specs=in_specs,
            out_specs=pl.BlockSpec((blk, dim_pad), lambda i: (i, 0)),
            compiler_params=pltpu.CompilerParams(
                dimension_semantics=("parallel",)),
        )(*operands)
        return out[:B, :dim]

    if rng_key is None:
        rng_key = jax.random.PRNGKey(0)

    # TODO(synk): thread a fresh PRNG key per call for true torch.randn_like behavior.
    def fallback():
        return jax.random.normal(rng_key, (B, dim), jnp.float32)

    # Empty-memory path is only evaluated when actually taken (lax.cond).
    return lax.cond(prepared["any_used"], run_kernel, fallback)


def _reference_forward(query, context, mem_keys, mem_values, mem_contexts,
                       mem_timestamps, used_slots, current_time, time_weight=0.1):
    """Pure-JAX reference mirroring the PyTorch forward."""
    M, d1, d2 = mem_keys.shape
    used_mask = used_slots.astype(jnp.float32)
    qm = query.reshape(query.shape[0], d1, d2)
    scores = jnp.einsum('bij,mij->bm', qm, mem_keys)
    if context is not None:
        scores = scores + 0.5 * jnp.einsum('bc,mc->bm', context, mem_contexts)
    time_decay = jnp.exp(-time_weight * (current_time - mem_timestamps.squeeze()))
    scores = scores + 0.3 * time_decay[None, :]
    scores = scores * used_mask[None, :] + (1.0 - used_mask[None, :]) * (-1.0e9)
    attn = jax.nn.softmax(scores, axis=-1)
    retrieved = jnp.einsum('bm,mij->bij', attn, mem_values)
    return retrieved.reshape(query.shape[0], d1 * d2)


if __name__ == "__main__":
    # Module hyperparameters (defaults d1=d2=8 -> dim=64), small shapes.
    matrix_dim1, matrix_dim2 = 8, 8
    dim = matrix_dim1 * matrix_dim2
    memory_size = 32
    context_dim = 16
    batch = 4
    current_time = 10.0
    time_weight = 0.1

    key = jax.random.PRNGKey(0)
    k_query, k_ctx, k_mk, k_mv, k_mc, k_fb, k_qbig, k_cbig = jax.random.split(key, 8)

    # Synthetic "parameters" (mirroring __init__ scaling of 0.1 * randn).
    mem_keys = 0.1 * jax.random.normal(k_mk, (memory_size, matrix_dim1, matrix_dim2), jnp.float32)
    mem_values = 0.1 * jax.random.normal(k_mv, (memory_size, matrix_dim1, matrix_dim2), jnp.float32)
    mem_contexts = 0.1 * jax.random.normal(k_mc, (memory_size, context_dim), jnp.float32)
    # First half of memory written at times 0..15.
    mem_timestamps = jnp.concatenate(
        [jnp.arange(memory_size // 2, dtype=jnp.float32),
         jnp.zeros(memory_size - memory_size // 2, dtype=jnp.float32)]
    ).reshape(memory_size, 1)
    used_slots = jnp.arange(memory_size) < (memory_size // 2)

    # One-time parameter prep (cached across forward calls).
    prepared = prepare_memory_params(mem_keys, mem_values, mem_contexts,
                                     mem_timestamps, used_slots)

    fwd = jax.jit(episodic_memory_forward)

    # 1) Small batch with context.
    query = jax.random.normal(k_query, (batch, dim), jnp.float32)
    context = jax.random.normal(k_ctx, (batch, context_dim), jnp.float32)
    out = jax.block_until_ready(fwd(prepared, query, context, current_time, time_weight, k_fb))
    ref = _reference_forward(query, context, mem_keys, mem_values, mem_contexts,
                             mem_timestamps, used_slots, current_time, time_weight)
    assert out.shape == (batch, dim)
    assert jnp.allclose(out, ref, rtol=1e-3, atol=2e-3), "mismatch vs JAX reference (ctx)"

    # 2) No-context variant (separate static trace / kernel).
    out_nc = jax.block_until_ready(fwd(prepared, query, None, current_time, time_weight, k_fb))
    ref_nc = _reference_forward(query, None, mem_keys, mem_values, mem_contexts,
                                mem_timestamps, used_slots, current_time, time_weight)
    assert jnp.allclose(out_nc, ref_nc, rtol=1e-3, atol=2e-3), "mismatch vs JAX reference (no ctx)"

    # 3) Larger batched call exercising grid > 1 (row axis sharded on v7x megacore).
    big_b = 256
    query_big = jax.random.normal(k_qbig, (big_b, dim), jnp.float32)
    context_big = jax.random.normal(k_cbig, (big_b, context_dim), jnp.float32)
    out_big = jax.block_until_ready(
        fwd(prepared, query_big, context_big, current_time, time_weight, k_fb))
    ref_big = _reference_forward(query_big, context_big, mem_keys, mem_values, mem_contexts,
                                 mem_timestamps, used_slots, current_time, time_weight)
    assert out_big.shape == (big_b, dim)
    assert jnp.allclose(out_big, ref_big, rtol=1e-3, atol=2e-3), "mismatch vs JAX reference (big)"

    # 4) Empty-memory fallback path: kernel is skipped, Gaussian noise returned.
    prepared_empty = prepare_memory_params(
        mem_keys, mem_values, mem_contexts, mem_timestamps,
        jnp.zeros(memory_size, dtype=bool))
    out_empty = jax.block_until_ready(
        fwd(prepared_empty, query, context, current_time, time_weight, k_fb))
    assert out_empty.shape == (batch, dim)
    assert bool(jnp.all(jnp.isfinite(out_empty)))

    print("KERNEL_OK")
</pallas_src>

<mosaic_0001>
module attributes {stable_mosaic.version = 11 : i64} {
  func.func @kernel(%arg0: i32, %arg1: memref<2xf32, #tpu.memory_space<smem>>, %arg2: memref<8x64xf32, #tpu.memory_space<vmem>>, %arg3: memref<8x16xf32, #tpu.memory_space<vmem>>, %arg4: memref<128x384xf32, #tpu.memory_space<vmem>>, %arg5: memref<2x128xf32, #tpu.memory_space<vmem>>, %arg6: memref<8x128xf32, #tpu.memory_space<vmem>>) attributes {dimension_semantics = [#tpu.dimension_semantics<parallel>], iteration_bounds = array<i64: 1>, scalar_prefetch = 0 : i64, scratch_operands = 0 : i64, tpu.core_type = #tpu.core_type<tc>, window_params = [{transform_indices = @transform_0, window_bounds = array<i64: 2>}, {transform_indices = @transform_1, window_bounds = array<i64: 8, 64>}, {transform_indices = @transform_2, window_bounds = array<i64: 8, 16>}, {pipeline_mode = #tpu.pipeline_mode<synchronous>, transform_indices = @transform_3, window_bounds = array<i64: 128, 384>}, {pipeline_mode = #tpu.pipeline_mode<synchronous>, transform_indices = @transform_4, window_bounds = array<i64: 2, 128>}, {transform_indices = @transform_5, window_bounds = array<i64: 8, 128>}]} {
    %c0 = arith.constant 0 : index
    %0 = memref.load %arg1[%c0] : memref<2xf32, #tpu.memory_space<smem>>
    %c1 = arith.constant 1 : index
    %1 = memref.load %arg1[%c1] : memref<2xf32, #tpu.memory_space<smem>>
    %c0_0 = arith.constant 0 : index
    %c0_1 = arith.constant 0 : index
    %2 = vector.load %arg2[%c0_0, %c0_1] : memref<8x64xf32, #tpu.memory_space<vmem>>, vector<8x64xf32>
    %c0_2 = arith.constant 0 : index
    %c0_3 = arith.constant 0 : index
    %3 = vector.load %arg4[%c0_2, %c0_3] : memref<128x384xf32, #tpu.memory_space<vmem>>, vector<128x64xf32>
    %cst = arith.constant dense<0.000000e+00> : vector<8x128xf32>
    %4 = tpu.matmul %2, %3, %cst {dimension_numbers = #tpu.dot_dimension_numbers<[1], [1], [0], [0], [0, 0, 1, 0], [], []>} : vector<8x64xf32>, vector<128x64xf32>, vector<8x128xf32> -> vector<8x128xf32>
    %c0_4 = arith.constant 0 : index
    %c0_5 = arith.constant 0 : index
    %5 = vector.load %arg3[%c0_4, %c0_5] : memref<8x16xf32, #tpu.memory_space<vmem>>, vector<8x16xf32>
    %c0_6 = arith.constant 0 : index
    %c128 = arith.constant 128 : index
    %6 = vector.load %arg4[%c0_6, %c128] : memref<128x384xf32, #tpu.memory_space<vmem>>, vector<128x16xf32>
    %cst_7 = arith.constant dense<0.000000e+00> : vector<8x128xf32>
    %7 = tpu.matmul %5, %6, %cst_7 {dimension_numbers = #tpu.dot_dimension_numbers<[1], [1], [0], [0], [0, 0, 1, 0], [], []>} : vector<8x16xf32>, vector<128x16xf32>, vector<8x128xf32> -> vector<8x128xf32>
    %8 = arith.addf %4, %7 : vector<8x128xf32>
    %c0_8 = arith.constant 0 : index
    %c0_9 = arith.constant 0 : index
    %9 = vector.load %arg5[%c0_8, %c0_9] : memref<2x128xf32, #tpu.memory_space<vmem>>, vector<1x128xf32>
    %c1_10 = arith.constant 1 : index
    %c0_11 = arith.constant 0 : index
    %10 = vector.load %arg5[%c1_10, %c0_11] : memref<2x128xf32, #tpu.memory_space<vmem>>, vector<1x128xf32>
    %cst_12 = arith.constant 0.000000e+00 : f32
    %11 = arith.subf %cst_12, %1 : f32
    %12 = vector.broadcast %0 : f32 to vector<1x128xf32>
    %13 = arith.subf %12, %9 : vector<1x128xf32>
    %14 = vector.broadcast %11 : f32 to vector<1x128xf32>
    %15 = arith.mulf %14, %13 : vector<1x128xf32>
    %16 = math.exp %15 : vector<1x128xf32>
    %cst_13 = arith.constant 3.000000e-01 : f32
    %17 = vector.broadcast %cst_13 : f32 to vector<1x128xf32>
    %18 = arith.mulf %17, %16 : vector<1x128xf32>
    %19 = vector.broadcast %18 : vector<1x128xf32> to vector<8x128xf32>
    %20 = arith.addf %8, %19 : vector<8x128xf32>
    %21 = vector.broadcast %10 : vector<1x128xf32> to vector<8x128xf32>
    %22 = arith.addf %20, %21 : vector<8x128xf32>
    %cst_14 = arith.constant dense<0xFF800000> : vector<8xf32>
    %23 = vector.multi_reduction <maximumf>, %22, %cst_14 [1] : vector<8x128xf32> to vector<8xf32>
    %24 = vector.shape_cast %23 : vector<8xf32> to vector<8x1xf32>
    %25 = vector.broadcast %24 : vector<8x1xf32> to vector<8x128xf32>
    %26 = arith.subf %22, %25 : vector<8x128xf32>
    %27 = math.exp %26 : vector<8x128xf32>
    %cst_15 = arith.constant dense<0.000000e+00> : vector<8xf32>
    %28 = vector.multi_reduction <add>, %27, %cst_15 [1] : vector<8x128xf32> to vector<8xf32>
    %29 = vector.shape_cast %28 : vector<8xf32> to vector<8x1xf32>
    %30 = vector.broadcast %29 : vector<8x1xf32> to vector<8x128xf32>
    %31 = arith.divf %27, %30 : vector<8x128xf32>
    %c0_16 = arith.constant 0 : index
    %c256 = arith.constant 256 : index
    %32 = vector.load %arg4[%c0_16, %c256] : memref<128x384xf32, #tpu.memory_space<vmem>>, vector<128x128xf32>
    %cst_17 = arith.constant dense<0.000000e+00> : vector<8x128xf32>
    %33 = tpu.matmul %31, %32, %cst_17 {dimension_numbers = #tpu.dot_dimension_numbers<[1], [0], [0], [1], [0, 0, 1, 1], [], []>} : vector<8x128xf32>, vector<128x128xf32>, vector<8x128xf32> -> vector<8x128xf32>
    %c0_18 = arith.constant 0 : index
    %c0_19 = arith.constant 0 : index
    %34 = vector.load %arg6[%c0_18, %c0_19] : memref<8x128xf32, #tpu.memory_space<vmem>>, vector<8x128xf32>
    tpu.vector_store %arg6[%c0_18, %c0_19], %33 {strides = array<i32>} : memref<8x128xf32, #tpu.memory_space<vmem>>, vector<8x128xf32>,
    return
  }
  func.func @transform_0(%arg0: i32) -> i32 {
    %c0_i32 = arith.constant 0 : i32
    %c0_i32_0 = arith.constant 0 : i32
    return %c0_i32 : i32
  }
  func.func @transform_1(%arg0: i32) -> (i32, i32) {
    %c0_i32 = arith.constant 0 : i32
    %c0_i32_0 = arith.constant 0 : i32
    return %arg0, %c0_i32 : i32, i32
  }
  func.func @transform_2(%arg0: i32) -> (i32, i32) {
    %c0_i32 = arith.constant 0 : i32
    %c0_i32_0 = arith.constant 0 : i32
    return %arg0, %c0_i32 : i32, i32
  }
  func.func @transform_3(%arg0: i32) -> (i32, i32) {
    %c0_i32 = arith.constant 0 : i32
    %c0_i32_0 = arith.constant 0 : i32
    %c0_i32_1 = arith.constant 0 : i32
    return %c0_i32, %c0_i32_0 : i32, i32
  }
  func.func @transform_4(%arg0: i32) -> (i32, i32) {
    %c0_i32 = arith.constant 0 : i32
    %c0_i32_0 = arith.constant 0 : i32
    %c0_i32_1 = arith.constant 0 : i32
    return %c0_i32, %c0_i32_0 : i32, i32
  }
  func.func @transform_5(%arg0: i32) -> (i32, i32) {
    %c0_i32 = arith.constant 0 : i32
    %c0_i32_0 = arith.constant 0 : i32
    return %arg0, %c0_i32 : i32, i32
  }
}

</mosaic_0001>

<bundles_post_ra>
// kernel: branch_1_fun.3
= control target key start
LH: loop header
LB: loop body
LE: loop exit
PB: predicated region body
PF: predicated region fallthrough
CT: control target
= control target key end

     0   :  { %10 = vsyncpa [#allocation4], 0  ;;  %s923_s0 = inlined_call_operand.vmem [shape: f32[2], index: 0, kind: input, shape index: {}]   ;;  %s924_s1 = inlined_call_operand.vmem [shape: f32[8,64], index: 1, kind: input, shape index: {}]   ;;  %s925_s2 = inlined_call_operand.vmem [shape: f32[8,16], index: 2, kind: input, shape index: {}]   ;;  %s926_s3 = inlined_call_operand.hbm [shape: f32[128,384], index: 3, kind: input, shape index: {}]   ;;  %s927_s4 = inlined_call_operand.vmem [shape: f32[2,128], index: 4, kind: input, shape index: {}]   ;;  %s928_s5 = inlined_call_operand.vmem [shape: f32[8,128], index: 5, kind: output, shape index: {}]  }
   0x1   :  { %s18_s20 = sshll.u32 %s923_s0, 4  ;;  %s19_s20 = int_to_ptr.vmem [resolvable:$true] %s18_s20 }
   0x2   :  { %11 = vsyncpa [#allocation3], 0  ;;  %s742_s21 = scalar_lea.vmem %s19_s20, 16  ;;  %p747_p1 = scmp.lt.s32.totalorder %s19_s20, %s19_s20 }
   0x3   :  { %p743_p0 = scmp.ne.s32.totalorder %s19_s20, %s742_s21  ;;  %p748_p2 = scmp.lt.s32.totalorder %s742_s21, %s742_s21 }
   0x5   :  { %p749_p3 = por %p748_p2, %p747_p1 }
   0x7   :  { %p750_p4 = pnand %p749_p3, %p743_p0 }
   0x9   :  { %753 = shalt.err (!%p750_p4)
}
   0xa   :  { %s780_s22 = smov [#allocation2]   ;;  %s781_s23 = smov [#allocation5]  }
   0xb   :  { %21 = dma.vmem_to_smem %s19_s20, 16, %s780_s22, [#allocation4]  }
   0xc   :  { %s31_s24 = sshll.u32 %s781_s23, 4  ;;  %s754_s27 = scalar_lea.hbm %s926_s3, 6144  ;;  %s32_s24 = int_to_ptr.vmem [resolvable:$true] %s31_s24 }
   0xd   :  { %p755_p5 = scmp.ne.s32.totalorder %s926_s3, %s754_s27  ;;  %p758_p6 = scmp.lt.u32.totalorder %s754_s27, %s926_s3 }
   0xf   :  { %p760_p7 = pnand %p758_p6, %p755_p5 }
  0x11   :  { %763 = shalt.err (!%p760_p7)
}
  0x12   :  { %s764_s6 = scalar_lea.vmem %s32_s24, 6144  ;;  %p769_p9 = scmp.lt.s32.totalorder %s32_s24, %s32_s24 }
  0x13   :  { %p765_p8 = scmp.ne.s32.totalorder %s32_s24, %s764_s6  ;;  %p770_p10 = scmp.lt.s32.totalorder %s764_s6, %s764_s6 }
  0x15   :  { %p771_p11 = por %p770_p10, %p769_p9 }
  0x17   :  { %p772_p12 = pnand %p771_p11, %p765_p8 }
  0x19   :  { %775 = shalt.err (!%p772_p12)
}
  0x1a   :  { %s782_s7 = smov 384   ;;  %s783_s8 = smov 24  }
  0x1b   :  { %37 = dma.hbm_to_vmem [thread:$0]  %s926_s3, 6144, %s32_s24, [#allocation3], %s782_s7, %s782_s7, %s783_s8  }
  0x1c   :  { %776 = dma.done.wait [#allocation4], 16  }
  0x1d   :  { %777 = vsyncadd [#allocation4], 4294967280 }
  0x1e   :  { %778 = dma.done.wait [#allocation3], 6144  }
  0x1f   :  { %779 = vsyncadd [#allocation3], 4294961152 }
  0x20   :  { %46 = sfence }
  0x21   :  { %v67_v0 = vld [vmem:[#allocation5 + $0x8] sm:$0xff]  ;;  %v68_v1 = vld [vmem:[#allocation5 + $0x20] sm:$0xff]  ;;  %vm83_vm0 = vcmask 130048   ;;  %vm205_vm1 = vcmask 523264   ;;  %v784_v3 = vmov 0.0|0.0   ;;  %v51_v6 = vld [vmem:[#allocation5 + $0x18] sm:$0xff]  ;;  %v337_v60 = vlaneseq }
  0x22   :  { %v50_v2 = vld [vmem:[#allocation5] sm:$0xff]  ;;  %641 = vmatprep.subr.bf16.mxu0 %v784_v3  ;;  %673 = vmatprep.subr.bf16.mxu1 %v784_v3  ;;  %v642_v4 = vpack.c.bf16 %v68_v1, %v67_v0  ;;  %vm836_vm2 = vmpackc.low %vm83_vm0, %vm83_vm0  ;;  %vm785_vm4 = vmmov 0   ;;  %v786_v9 = vmov 0.0   ;;  %v69_v10 = vld [vmem:[#allocation5 + $0x38] sm:$0xff]  ;;  %s47_s14 = sld [smem:[#allocation2]]  ;;  %s449_s15 = sld [smem:[#allocation2 + $0x1]] }
  0x23   :  { %v674_v7 = vpack.c.bf16 %v51_v6, %v50_v2  ;;  %vm842_vm3 = vmpackc.low %vm205_vm1, %vm205_vm1  ;;  %568 = vmatprep.mubr.msk.f32.mxu0 %vm785_vm4, %v786_v9  ;;  %603 = vmatprep.mubr.msk.f32.mxu1 %vm785_vm4, %v786_v9  ;;  %v70_v11 = vld [vmem:[#allocation5 + $0x50] sm:$0xff]  ;;  %v53_v13 = vld [vmem:[#allocation5 + $0x48] sm:$0xff]  ;;  %v338_v61 = vshrl.u32 %v337_v60, 7 }
  0x24   :  { %644 = vmatpush3.bf16.xpose.msk.msra.mxu0 %vm836_vm2, %v642_v4  ;;  %v52_v12 = vld [vmem:[#allocation5 + $0x30] sm:$0xff]  ;;  %v646_v14 = vpack.c.bf16 %v70_v11, %v69_v10  ;;  %v71_v16 = vld [vmem:[#allocation5 + $0x68] sm:$0xff]  ;;  %v72_v17 = vld [vmem:[#allocation5 + $0x80] sm:$0xff] }
  0x25   :  { %676 = vmatpush3.bf16.xpose.msk.msra.mxu1 %vm842_vm3, %v674_v7  ;;  %645 = vmatprep.subr.bf16.mxu0 %v784_v3  ;;  %v678_v15 = vpack.c.bf16 %v53_v13, %v52_v12  ;;  %v54_v18 = vld [vmem:[#allocation5 + $0x60] sm:$0xff]  ;;  %v55_v19 = vld [vmem:[#allocation5 + $0x78] sm:$0xff]  ;;  %v650_v20 = vpack.c.bf16 %v72_v17, %v71_v16  ;;  %v74_v23 = vld [vmem:[#allocation5 + $0xb0] sm:$0xff]  ;;  %v339_v0 = vsub.s32 0, %v338_v61 }
  0x26   :  { %677 = vmatprep.subr.bf16.mxu1 %v784_v3  ;;  %v682_v21 = vpack.c.bf16 %v55_v19, %v54_v18  ;;  %v73_v22 = vld [vmem:[#allocation5 + $0x98] sm:$0xff]  ;;  %v56_v24 = vld [vmem:[#allocation5 + $0x90] sm:$0xff]  ;;  %v57_v25 = vld [vmem:[#allocation5 + $0xa8] sm:$0xff] }
  0x27   :  { %v654_v26 = vpack.c.bf16 %v74_v23, %v73_v22  ;;  %v686_v27 = vpack.c.bf16 %v57_v25, %v56_v24  ;;  %v75_v28 = vld [vmem:[#allocation5 + $0xc8] sm:$0xff]  ;;  %v76_v29 = vld [vmem:[#allocation5 + $0xe0] sm:$0xff]  ;;  %v59_v31 = vld [vmem:[#allocation5 + $0xd8] sm:$0xff] }
  0x28   :  { %v58_v30 = vld [vmem:[#allocation5 + $0xc0] sm:$0xff]  ;;  %v658_v32 = vpack.c.bf16 %v76_v29, %v75_v28  ;;  %v77_v34 = vld [vmem:[#allocation5 + $0xf8] sm:$0xff]  ;;  %v78_v35 = vld [vmem:[#allocation5 + $0x110] sm:$0xff]  ;;  %s329_s18 = ssub.f32 0.0, %s449_s15  ;;  %v330_v55 = vstv %s47_s14 }
  0x29   :  { %v690_v33 = vpack.c.bf16 %v59_v31, %v58_v30  ;;  %v60_v36 = vld [vmem:[#allocation5 + $0xf0] sm:$0xff]  ;;  %v61_v37 = vld [vmem:[#allocation5 + $0x108] sm:$0xff]  ;;  %v662_v38 = vpack.c.bf16 %v78_v35, %v77_v34  ;;  %v80_v41 = vld [vmem:[#allocation5 + $0x140] sm:$0xff] }
  0x2a   :  { %v694_v39 = vpack.c.bf16 %v61_v37, %v60_v36  ;;  %v79_v40 = vld [vmem:[#allocation5 + $0x128] sm:$0xff]  ;;  %v62_v42 = vld [vmem:[#allocation5 + $0x120] sm:$0xff]  ;;  %v63_v43 = vld [vmem:[#allocation5 + $0x138] sm:$0xff]  ;;  %v332_v57 = vstv %s329_s18 }
  0x2b   :  { %v666_v44 = vpack.c.bf16 %v80_v41, %v79_v40  ;;  %v698_v45 = vpack.c.bf16 %v63_v43, %v62_v42  ;;  %v81_v46 = vld [vmem:[#allocation5 + $0x158] sm:$0xff]  ;;  %v82_v47 = vld [vmem:[#allocation5 + $0x170] sm:$0xff]  ;;  %v65_v49 = vld [vmem:[#allocation5 + $0x168] sm:$0xff] }
  0x2c   :  { %648 = vmatpush3.bf16.xpose.msk.msra.mxu0 %vm836_vm2, %v646_v14  ;;  %v64_v48 = vld [vmem:[#allocation5 + $0x150] sm:$0xff]  ;;  %v670_v50 = vpack.c.bf16 %v82_v47, %v81_v46  ;;  %v66_v52 = vld [vmem:[%s925_s2] sm:$0xff]  ;;  %v357_v12 = vld [vmem:[#allocation5 + $0x28] sm:$0xff] }
  0x2d   :  { %680 = vmatpush3.bf16.xpose.msk.msra.mxu1 %vm842_vm3, %v678_v15  ;;  %649 = vmatprep.subr.bf16.mxu0 %v784_v3  ;;  %v702_v51 = vpack.c.bf16 %v65_v49, %v64_v48  ;;  %v49_v53 = vld [vmem:[%s924_s1] sm:$0xff]  ;;  %v356_v11 = vld [vmem:[#allocation5 + $0x10] sm:$0xff]  ;;  %v359_v15 = vld [vmem:[#allocation5 + $0x58] sm:$0xff] }
  0x2e   :  { %681 = vmatprep.subr.bf16.mxu1 %v784_v3  ;;  %v327_v54 = vld [vmem:[%s927_s4] sm:$0x1]  ;;  %v484_v8 = vld [vmem:[%s927_s4 + $0x1] ss:$0 sm:$0xff]  ;;  %v706_v14 = vpack.c.bf16 %v357_v12, %v356_v11  ;;  %v360_v17 = vld [vmem:[#allocation5 + $0x70] sm:$0xff] }
  0x2f   :  { %v331_v56 = vsub.f32 %v330_v55, %v327_v54  ;;  %v358_v13 = vld [vmem:[#allocation5 + $0x40] sm:$0xff]  ;;  %v361_v18 = vld [vmem:[#allocation5 + $0x88] sm:$0xff]  ;;  %v364_v23 = vld [vmem:[#allocation5 + $0xd0] sm:$0xff] }
  0x30   :  { %v709_v16 = vpack.c.bf16 %v359_v15, %v358_v13  ;;  %v712_v19 = vpack.c.bf16 %v361_v18, %v360_v17  ;;  %v365_v24 = vld [vmem:[#allocation5 + $0xe8] sm:$0xff]  ;;  %v366_v30 = vld [vmem:[#allocation5 + $0x100] sm:$0xff]  ;;  %v367_v31 = vld [vmem:[#allocation5 + $0x118] sm:$0xff] }
  0x31   :  { %v333_v58 = vmul.f32 %v332_v57, %v331_v56  ;;  %v718_v25 = vpack.c.bf16 %v365_v24, %v364_v23  ;;  %v369_v34 = vld [vmem:[#allocation5 + $0x148] sm:$0xff]  ;;  %v370_v36 = vld [vmem:[#allocation5 + $0x160] sm:$0xff]  ;;  %v371_v37 = vld [vmem:[#allocation5 + $0x178] sm:$0xff] }
  0x33   :  { %v334_v59 = vmul.f32 1.442695, %v333_v58 }
  0x34   :  { %652 = vmatpush3.bf16.xpose.msk.msra.mxu0 %vm836_vm2, %v650_v20  ;;  %v362_v20 = vld [vmem:[#allocation5 + $0xa0] sm:$0xff] }
  0x35   :  { %684 = vmatpush3.bf16.xpose.msk.msra.mxu1 %vm842_vm3, %v682_v21  ;;  %653 = vmatprep.subr.bf16.mxu0 %v784_v3  ;;  %736 = vpow2.f32 %v334_v59  ;;  %v363_v21 = vld [vmem:[#allocation5 + $0xb8] sm:$0xff] }
  0x36   :  { %685 = vmatprep.subr.bf16.mxu1 %v784_v3  ;;  %v715_v22 = vpack.c.bf16 %v363_v21, %v362_v20 }
  0x3c   :  { %656 = vmatpush3.bf16.xpose.msk.msra.mxu0 %vm836_vm2, %v654_v26 }
  0x3d   :  { %688 = vmatpush3.bf16.xpose.msk.msra.mxu1 %vm842_vm3, %v686_v27  ;;  %657 = vmatprep.subr.bf16.mxu0 %v784_v3 }
  0x3e   :  { %689 = vmatprep.subr.bf16.mxu1 %v784_v3 }
  0x3f   :  { %v737_v62 = vpop.eup %736 }
  0x40   :  { %v336_v63 = vmul.f32 0.3, %v737_v62 }
  0x42   :  { %v340_v2 = vrot.slane %v336_v63, %v339_v0 }
  0x44   :  { %660 = vmatpush3.bf16.xpose.msk.msra.mxu0 %vm836_vm2, %v658_v32  ;;  %v721_v32 = vpack.c.bf16 %v367_v31, %v366_v30 }
  0x45   :  { %692 = vmatpush3.bf16.xpose.msk.msra.mxu1 %vm842_vm3, %v690_v33  ;;  %661 = vmatprep.subr.bf16.mxu0 %v784_v3  ;;  %v368_v33 = vld [vmem:[#allocation5 + $0x130] sm:$0xff] }
  0x46   :  { %693 = vmatprep.subr.bf16.mxu1 %v784_v3  ;;  %v724_v35 = vpack.c.bf16 %v369_v34, %v368_v33 }
  0x4c   :  { %664 = vmatpush3.bf16.xpose.msk.msra.mxu0 %vm836_vm2, %v662_v38  ;;  %v727_v38 = vpack.c.bf16 %v371_v37, %v370_v36 }
  0x4d   :  { %696 = vmatpush3.bf16.xpose.msk.msra.mxu1 %vm842_vm3, %v694_v39  ;;  %665 = vmatprep.subr.bf16.mxu0 %v784_v3 }
  0x4e   :  { %697 = vmatprep.subr.bf16.mxu1 %v784_v3 }
  0x54   :  { %668 = vmatpush3.bf16.xpose.msk.msra.mxu0 %vm836_vm2, %v666_v44 }
  0x55   :  { %700 = vmatpush3.bf16.xpose.msk.msra.mxu1 %vm842_vm3, %v698_v45  ;;  %669 = vmatprep.subr.bf16.mxu0 %v784_v3 }
  0x56   :  { %701 = vmatprep.subr.bf16.mxu1 %v784_v3 }
  0x5c   :  { %672 = vmatpush3.bf16.xpose.msk.msra.mxu0 %vm836_vm2, %v670_v50 }
  0x5d   :  { %704 = vmatpush3.bf16.xpose.msk.msra.mxu1 %vm842_vm3, %v702_v51  ;;  %705 = vmatprep.subr.bf16.mxu0 %v784_v3 }
  0x63   :  { %569 = vmatmul.mubr.msk.f32.vlgmr.msra.gmra.mrb[0].mxu0 %vm83_vm0, %v66_v52 }
  0x64   :  { %604 = vmatmul.mubr.msk.f32.vlgmr.msra.gmra.mrb[0].mxu1 %vm205_vm1, %v49_v53  ;;  %638 = vmatprep.mubr.msk.f32.mxu0 %vm785_vm4, %v786_v9 }
  0x65   :  { %707 = vmatpush3.bf16.msra.mxu0 %v706_v14 }
  0x66   :  { %708 = vmatprep.subr.bf16.mxu0 %v784_v3 }
  0x69   :  { %710 = vmatpush3.bf16.msra.mxu0 %v709_v16 }
  0x6a   :  { %711 = vmatprep.subr.bf16.mxu0 %v784_v3 }
  0x6d   :  { %713 = vmatpush3.bf16.msra.mxu0 %v712_v19 }
  0x6e   :  { %714 = vmatprep.subr.bf16.mxu0 %v784_v3 }
  0x71   :  { %716 = vmatpush3.bf16.msra.mxu0 %v715_v22 }
  0x72   :  { %717 = vmatprep.subr.bf16.mxu0 %v784_v3 }
  0x75   :  { %719 = vmatpush3.bf16.msra.mxu0 %v718_v25 }
  0x76   :  { %720 = vmatprep.subr.bf16.mxu0 %v784_v3 }
  0x79   :  { %722 = vmatpush3.bf16.msra.mxu0 %v721_v32 }
  0x7a   :  { %723 = vmatprep.subr.bf16.mxu0 %v784_v3 }
  0x7d   :  { %725 = vmatpush3.bf16.msra.mxu0 %v724_v35 }
  0x7e   :  { %726 = vmatprep.subr.bf16.mxu0 %v784_v3 }
  0x81   :  { %728 = vmatpush3.bf16.msra.mxu0 %v727_v38 }
 0x136   :  { %v201_v1 = vpop.f32.mrb[0].mxu0 }
 0x137   :  { %v323_v4 = vpop.f32.mrb[0].mxu1  ;;  %v570_v5 = vpop.f32.mrb[1].mxu0 }
 0x138   :  { %v324_v6 = vadd.f32 %v323_v4, %v201_v1  ;;  %v605_v7 = vpop.f32.mrb[1].mxu1 }
 0x13a   :  { %v341_v9 = vadd.f32 %v340_v2, %v324_v6 }
 0x13c   :  { %v346_v10 = vadd.f32 %v484_v8, %v341_v9 }
 0x13e   :  { %347 = vmax.xlane.f32.xlu0 %v346_v10 }
 0x1cb   :  { %v348_v26 = vpop.xlane.xlu0 %347 }
 0x1cc   :  { %v349_v27 = vsub.f32 %v346_v10, %v348_v26 }
 0x1ce   :  { %v350_v28 = vmul.f32 1.442695, %v349_v27 }
 0x1d0   :  { %738 = vpow2.f32 %v350_v28 }
 0x1da   :  { %v739_v29 = vpop.eup %738 }
 0x1db   :  { %352 = vadd.xlane.f32.xlu0 %v739_v29 }
 0x268   :  { %v353_v39 = vpop.xlane.xlu0 %352 }
 0x269   :  { %740 = vrcp.f32 %v353_v39 }
 0x273   :  { %v741_v40 = vpop.eup %740 }
 0x274   :  { %v355_v41 = vmul.f32 %v741_v40, %v739_v29 }
 0x276   :  { %639 = vmatmul.mubr.f32.vlgmr.msra.gmra.mrb[2].mxu0 %v355_v41 }
 0x349   :  { %v438_v42 = vpop.f32.mrb[2].mxu0 }
 0x34a   :  { %442 = vst [vmem:[%s928_s5] sm:$0xff] %v438_v42  ;;  %v640_v43 = vpop.f32.mrb[3].mxu0 }
 0x34b   :  { %447 = vsyncpa [#allocation3], 1 }
 0x34c   :  { %448 = vsyncpa [#allocation4], 1 }

</bundles_post_ra>
